<compile_context>
chip_gen: v7x
topology: tpu7x:2x2x1
jax: 0.10.0
libtpu: 0.0.40
codegen_flags: <defaults>
</compile_context>

<pallas_src>
import math

import jax
import jax.numpy as jnp
from jax import lax
from jax.experimental import pallas as pl
from jax.experimental.pallas import tpu as pltpu

DROPOUT = 0.1  # nn.Dropout is identity in eval mode; see TODO in the epilogues.


def _round_up(n, m):
    return ((n + m - 1) // m) * m


def _gelu_exact(x):
    # PyTorch nn.GELU() default = exact erf formulation (computed in f32).
    return 0.5 * x * (1.0 + lax.erf(x * (1.0 / math.sqrt(2.0))))


# ---------------------------------------------------------------------------
# Kernels
# ---------------------------------------------------------------------------
def _ff_resident_kernel(x_ref, w1_ref, b1_ref, w2_ref, b2_ref, o_ref):
    """Weights VMEM-resident: one fused Linear->GELU->Linear per row tile."""
    x = x_ref[...].astype(w1_ref.dtype)                       # MXU operand dtype
    h = jnp.dot(x, w1_ref[...], preferred_element_type=jnp.float32)
    h = _gelu_exact(h + b1_ref[...].astype(jnp.float32))
    y = jnp.dot(h.astype(w2_ref.dtype), w2_ref[...],
                preferred_element_type=jnp.float32)
    # TODO(synk): nn.Dropout skipped (eval-mode identity); training mode would
    # build a keep-mask via pltpu.prng_seed + pltpu.prng_random_bits here.
    o_ref[...] = (y + b2_ref[...].astype(jnp.float32)).astype(o_ref.dtype)


def _ff_reduction_kernel(x_ref, w1_ref, b1_ref, w2_ref, b2_ref, o_ref, acc_ref):
    """Hidden dim H streamed in tiles; f32 accumulator in VMEM scratch."""
    k = pl.program_id(1)

    @pl.when(k == 0)
    def _():
        acc_ref[...] = jnp.zeros_like(acc_ref)

    x = x_ref[...].astype(w1_ref.dtype)
    h = jnp.dot(x, w1_ref[...], preferred_element_type=jnp.float32)
    h = _gelu_exact(h + b1_ref[...].astype(jnp.float32))
    acc_ref[...] += jnp.dot(h.astype(w2_ref.dtype), w2_ref[...],
                            preferred_element_type=jnp.float32)

    @pl.when(k == pl.num_programs(1) - 1)
    def _():
        # TODO(synk): nn.Dropout skipped (eval-mode identity).
        o_ref[...] = (acc_ref[...]
                      + b2_ref[...].astype(jnp.float32)).astype(o_ref.dtype)


# ---------------------------------------------------------------------------
# Tile / path selection
# ---------------------------------------------------------------------------
def _vmem_capacity_bytes():
    try:
        info = pltpu.get_tpu_info()
        cap = int(getattr(info, "vmem_capacity_bytes", 0) or 0)
        if cap > 0:
            return cap
    except Exception:
        pass
    return 64 << 20  # conservative fallback = v7x per-TC VMEM


def _tm_candidates(tm_desired):
    cands, t = [], max(8, (tm_desired // 8) * 8)
    while True:
        cands.append(t)
        if t <= 8:
            break
        t = max(8, ((t // 2) // 8) * 8)
    return cands


def _th_candidates(H):
    cands = [t for t in (4096, 2048, 1024, 512, 256, 128) if t <= H and H % t == 0]
    return cands or [H]


# ---------------------------------------------------------------------------
# Wrapper
# ---------------------------------------------------------------------------
def feedforward(x, w1, b1, w2, b2, *, compute_dtype=None, out_dtype=None,
                tm=None, max_vmem_bytes=None):
    """Pallas TPU forward of nanogpt FeedForward (eval-mode dropout)."""
    B, T, D = x.shape
    H = w1.shape[1]
    N = B * T
    out_dtype = jnp.dtype(out_dtype or x.dtype)

    if compute_dtype is None:
        # Preserve the module's f32 numerics by default; bf16 inputs (or an
        # explicit compute_dtype=jnp.bfloat16) take the fast single-pass MXU path.
        compute_dtype = (jnp.bfloat16
                         if x.dtype in (jnp.dtype(jnp.bfloat16), jnp.dtype(jnp.float16))
                         else x.dtype)
    compute_dtype = jnp.dtype(compute_dtype)

    x2 = x.reshape(N, D)
    # Cast the bandwidth-dominant, reused weights once in the wrapper so the
    # kernel streams/keeps them in the MXU operand dtype; biases stay f32.
    w1c = w1.astype(compute_dtype)
    w2c = w2.astype(compute_dtype)
    b1_2 = b1.reshape(1, H).astype(jnp.float32)
    b2_2 = b2.reshape(1, D).astype(jnp.float32)

    in_b = jnp.dtype(x.dtype).itemsize
    w_b = compute_dtype.itemsize
    out_b = out_dtype.itemsize

    cap = _vmem_capacity_bytes()
    budget = max_vmem_bytes if max_vmem_bytes is not None else (cap * 3) // 4

    tm_desired = min(tm if tm is not None else 1024, _round_up(N, 8))

    def resident_bytes(tm_):
        return (2 * D * H * w_b + 2 * H * 4            # W1 + b1 (double-buffered)
                + 2 * H * D * w_b + 2 * D * 4          # W2 + b2
                + 2 * tm_ * D * in_b                   # x tiles
                + 2 * tm_ * D * out_b                  # out tiles
                + tm_ * H * (4 + w_b)                  # f32 GELU tile + MXU-dtype copy
                + tm_ * D * 4)                         # f32 epilogue headroom

    def reduction_bytes(tm_, th_):
        return (2 * tm_ * D * in_b
                + 2 * D * th_ * w_b + 2 * th_ * 4
                + 2 * th_ * D * w_b + 2 * D * 4
                + 2 * tm_ * D * out_b
                + tm_ * D * 4                          # f32 accumulator scratch
                + tm_ * th_ * (4 + w_b))

    mode = None
    tm_eff = th_eff = None
    for tm_ in _tm_candidates(tm_desired):
        if resident_bytes(tm_) <= budget:
            mode, tm_eff, th_eff = "resident", tm_, H
            break
    if mode is None:
        for tm_ in _tm_candidates(tm_desired):
            for th_ in _th_candidates(H):
                if reduction_bytes(tm_, th_) <= budget:
                    mode, tm_eff, th_eff = "reduction", tm_, th_
                    break
            if mode is not None:
                break
    if mode is None:  # last resort: smallest tiles even if over budget
        mode, tm_eff, th_eff = "reduction", 8, _th_candidates(H)[-1]

    n_row_tiles = pl.cdiv(N, tm_eff)
    footprint = (resident_bytes(tm_eff) if mode == "resident"
                 else reduction_bytes(tm_eff, th_eff))
    vmem_limit = int(min(cap, max(16 << 20, footprint + footprint // 4)))

    weight_stream_factor = 1 if mode == "resident" else n_row_tiles
    cost = pl.CostEstimate(
        flops=4 * N * D * H,
        transcendentals=N * H,
        bytes_accessed=(N * D * (in_b + out_b)
                        + weight_stream_factor * (2 * D * H * w_b + (H + D) * 4)),
    )

    if mode == "resident":
        grid = (n_row_tiles,)
        in_specs = [
            pl.BlockSpec((tm_eff, D), lambda i: (i, 0)),      # x row tile
            pl.BlockSpec((D, H), lambda i: (0, 0)),           # W1 (resident)
            pl.BlockSpec((1, H), lambda i: (0, 0)),           # b1 (resident)
            pl.BlockSpec((H, D), lambda i: (0, 0)),           # W2 (resident)
            pl.BlockSpec((1, D), lambda i: (0, 0)),           # b2 (resident)
        ]
        out_specs = pl.BlockSpec((tm_eff, D), lambda i: (i, 0))
        scratch_shapes = []
        dim_sem = ("parallel",)
        kernel = _ff_resident_kernel
    else:
        # TODO(synk): pipeline_mode=pl.Buffered(3) on the weight BlockSpecs can
        # further hide weight DMA latency when VMEM headroom allows.
        grid = (n_row_tiles, H // th_eff)
        in_specs = [
            pl.BlockSpec((tm_eff, D), lambda i, k: (i, 0)),   # x row tile
            pl.BlockSpec((D, th_eff), lambda i, k: (0, k)),   # W1 column tile
            pl.BlockSpec((1, th_eff), lambda i, k: (0, k)),   # b1 tile
            pl.BlockSpec((th_eff, D), lambda i, k: (k, 0)),   # W2 row tile
            pl.BlockSpec((1, D), lambda i, k: (0, 0)),        # b2 (resident)
        ]
        out_specs = pl.BlockSpec((tm_eff, D), lambda i, k: (i, 0))
        scratch_shapes = [pltpu.VMEM((tm_eff, D), jnp.float32)]
        dim_sem = ("parallel", "arbitrary")
        kernel = _ff_reduction_kernel

    out = pl.pallas_call(
        kernel,
        out_shape=jax.ShapeDtypeStruct((N, D), out_dtype),
        grid_spec=pltpu.PrefetchScalarGridSpec(
            num_scalar_prefetch=0,
            grid=grid,
            in_specs=in_specs,
            out_specs=out_specs,
            scratch_shapes=scratch_shapes,
        ),
        compiler_params=pltpu.CompilerParams(
            dimension_semantics=dim_sem,
            vmem_limit_bytes=vmem_limit,
        ),
        cost_estimate=cost,
    )(x2, w1c, b1_2, w2c, b2_2)

    return out.reshape(B, T, D)


# ---------------------------------------------------------------------------
# Reference & tests
# ---------------------------------------------------------------------------
def feedforward_ref(x, w1, b1, w2, b2):
    h = jnp.dot(x, w1, precision=lax.Precision.HIGHEST) + b1
    h = _gelu_exact(h)
    return jnp.dot(h, w2, precision=lax.Precision.HIGHEST) + b2


def _make_params(key, D):
    H = 4 * D
    kw1, kb1, kw2, kb2 = jax.random.split(key, 4)
    bound1 = 1.0 / math.sqrt(D)
    w1 = jax.random.uniform(kw1, (D, H), jnp.float32, -bound1, bound1)
    b1 = jax.random.uniform(kb1, (H,), jnp.float32, -bound1, bound1)
    bound2 = 1.0 / math.sqrt(H)
    w2 = jax.random.uniform(kw2, (H, D), jnp.float32, -bound2, bound2)
    b2 = jax.random.uniform(kb2, (D,), jnp.float32, -bound2, bound2)
    return w1, b1, w2, b2


if __name__ == "__main__":
    key = jax.random.PRNGKey(0)
    kp1, kp2, kp3, kx1, kx2, kx3 = jax.random.split(key, 6)

    # Case 1: tiny config -> resident-weight path, single row tile, exact f32.
    B, T, D = 2, 8, 32
    x = jax.random.normal(kx1, (B, T, D), dtype=jnp.float32)
    w1, b1, w2, b2 = _make_params(kp1, D)
    y = jax.block_until_ready(feedforward(x, w1, b1, w2, b2))
    y_ref = feedforward_ref(x, w1, b1, w2, b2)
    assert jnp.allclose(y, y_ref, atol=1e-4, rtol=1e-4), "mismatch (case 1)"

    # Case 2: k-reduction path (forced via a tiny VMEM budget), multiple ragged
    # row tiles (N = 50, tm = 16, no host-side padding), several H steps, f32.
    B, T, D = 2, 25, 256
    x = jax.random.normal(kx2, (B, T, D), dtype=jnp.float32)
    w1, b1, w2, b2 = _make_params(kp2, D)
    y = jax.block_until_ready(
        feedforward(x, w1, b1, w2, b2, tm=16, max_vmem_bytes=2 << 20))
    y_ref = feedforward_ref(x, w1, b1, w2, b2)
    assert jnp.allclose(y, y_ref, atol=1e-4, rtol=1e-4), "mismatch (case 2)"

    # Case 3: bf16 MXU operands (weights cast once in the wrapper), resident path.
    B, T, D = 4, 64, 256
    x = jax.random.normal(kx3, (B, T, D), dtype=jnp.float32)
    w1, b1, w2, b2 = _make_params(kp3, D)
    y = jax.block_until_ready(
        feedforward(x, w1, b1, w2, b2, compute_dtype=jnp.bfloat16))
    y_ref = feedforward_ref(x, w1, b1, w2, b2)
    assert jnp.allclose(y, y_ref, atol=5e-2, rtol=5e-2), "mismatch (case 3)"

    print("KERNEL_OK")
</pallas_src>

<mosaic_0001>
module attributes {stable_mosaic.version = 11 : i64} {
  func.func @_ff_resident_kernel(%arg0: i32, %arg1: memref<16x32xf32, #tpu.memory_space<vmem>>, %arg2: memref<32x128xf32, #tpu.memory_space<vmem>>, %arg3: memref<1x128xf32, #tpu.memory_space<vmem>>, %arg4: memref<128x32xf32, #tpu.memory_space<vmem>>, %arg5: memref<1x32xf32, #tpu.memory_space<vmem>>, %arg6: memref<16x32xf32, #tpu.memory_space<vmem>>) attributes {dimension_semantics = [#tpu.dimension_semantics<parallel>], iteration_bounds = array<i64: 1>, scalar_prefetch = 0 : i64, scratch_operands = 0 : i64, tpu.core_type = #tpu.core_type<tc>, window_params = [{transform_indices = @transform_0, window_bounds = array<i64: 16, 32>}, {pipeline_mode = #tpu.pipeline_mode<synchronous>, transform_indices = @transform_1, window_bounds = array<i64: 32, 128>}, {pipeline_mode = #tpu.pipeline_mode<synchronous>, transform_indices = @transform_2, window_bounds = array<i64: 1, 128>}, {pipeline_mode = #tpu.pipeline_mode<synchronous>, transform_indices = @transform_3, window_bounds = array<i64: 128, 32>}, {pipeline_mode = #tpu.pipeline_mode<synchronous>, transform_indices = @transform_4, window_bounds = array<i64: 1, 32>}, {transform_indices = @transform_5, window_bounds = array<i64: 16, 32>}]} {
    %c0 = arith.constant 0 : index
    %c0_0 = arith.constant 0 : index
    %0 = vector.load %arg1[%c0, %c0_0] : memref<16x32xf32, #tpu.memory_space<vmem>>, vector<16x32xf32>
    %c0_1 = arith.constant 0 : index
    %c0_2 = arith.constant 0 : index
    %1 = vector.load %arg2[%c0_1, %c0_2] : memref<32x128xf32, #tpu.memory_space<vmem>>, vector<32x128xf32>
    %cst = arith.constant dense<0.000000e+00> : vector<16x128xf32>
    %2 = tpu.matmul %0, %1, %cst {dimension_numbers = #tpu.dot_dimension_numbers<[1], [0], [0], [1], [0, 0, 1, 1], [], []>} : vector<16x32xf32>, vector<32x128xf32>, vector<16x128xf32> -> vector<16x128xf32>
    %c0_3 = arith.constant 0 : index
    %c0_4 = arith.constant 0 : index
    %3 = vector.load %arg3[%c0_3, %c0_4] : memref<1x128xf32, #tpu.memory_space<vmem>>, vector<1x128xf32>
    %4 = vector.broadcast %3 : vector<1x128xf32> to vector<16x128xf32>
    %5 = arith.addf %2, %4 : vector<16x128xf32>
    %cst_5 = arith.constant 5.000000e-01 : f32
    %6 = vector.broadcast %cst_5 : f32 to vector<16x128xf32>
    %7 = arith.mulf %6, %5 : vector<16x128xf32>
    %cst_6 = arith.constant 0.707106769 : f32
    %8 = vector.broadcast %cst_6 : f32 to vector<16x128xf32>
    %9 = arith.mulf %5, %8 : vector<16x128xf32>
    %10 = math.erf %9 : vector<16x128xf32>
    %cst_7 = arith.constant 1.000000e+00 : f32
    %11 = vector.broadcast %cst_7 : f32 to vector<16x128xf32>
    %12 = arith.addf %11, %10 : vector<16x128xf32>
    %13 = arith.mulf %7, %12 : vector<16x128xf32>
    %c0_8 = arith.constant 0 : index
    %c0_9 = arith.constant 0 : index
    %14 = vector.load %arg4[%c0_8, %c0_9] : memref<128x32xf32, #tpu.memory_space<vmem>>, vector<128x32xf32>
    %cst_10 = arith.constant dense<0.000000e+00> : vector<16x32xf32>
    %15 = tpu.matmul %13, %14, %cst_10 {dimension_numbers = #tpu.dot_dimension_numbers<[1], [0], [0], [1], [0, 0, 1, 1], [], []>} : vector<16x128xf32>, vector<128x32xf32>, vector<16x32xf32> -> vector<16x32xf32>
    %c0_11 = arith.constant 0 : index
    %c0_12 = arith.constant 0 : index
    %16 = vector.load %arg5[%c0_11, %c0_12] : memref<1x32xf32, #tpu.memory_space<vmem>>, vector<1x32xf32>
    %17 = vector.broadcast %16 : vector<1x32xf32> to vector<16x32xf32>
    %18 = arith.addf %15, %17 : vector<16x32xf32>
    %c0_13 = arith.constant 0 : index
    %c0_14 = arith.constant 0 : index
    %19 = vector.load %arg6[%c0_13, %c0_14] : memref<16x32xf32, #tpu.memory_space<vmem>>, vector<16x32xf32>
    tpu.vector_store %arg6[%c0_13, %c0_14], %18 {strides = array<i32>} : memref<16x32xf32, #tpu.memory_space<vmem>>, vector<16x32xf32>,
    return
  }
  func.func @transform_0(%arg0: i32) -> (i32, i32) {
    %c0_i32 = arith.constant 0 : i32
    %c0_i32_0 = arith.constant 0 : i32
    return %arg0, %c0_i32 : i32, i32
  }
  func.func @transform_1(%arg0: i32) -> (i32, i32) {
    %c0_i32 = arith.constant 0 : i32
    %c0_i32_0 = arith.constant 0 : i32
    %c0_i32_1 = arith.constant 0 : i32
    return %c0_i32, %c0_i32_0 : i32, i32
  }
  func.func @transform_2(%arg0: i32) -> (i32, i32) {
    %c0_i32 = arith.constant 0 : i32
    %c0_i32_0 = arith.constant 0 : i32
    %c0_i32_1 = arith.constant 0 : i32
    return %c0_i32, %c0_i32_0 : i32, i32
  }
  func.func @transform_3(%arg0: i32) -> (i32, i32) {
    %c0_i32 = arith.constant 0 : i32
    %c0_i32_0 = arith.constant 0 : i32
    %c0_i32_1 = arith.constant 0 : i32
    return %c0_i32, %c0_i32_0 : i32, i32
  }
  func.func @transform_4(%arg0: i32) -> (i32, i32) {
    %c0_i32 = arith.constant 0 : i32
    %c0_i32_0 = arith.constant 0 : i32
    %c0_i32_1 = arith.constant 0 : i32
    return %c0_i32, %c0_i32_0 : i32, i32
  }
  func.func @transform_5(%arg0: i32) -> (i32, i32) {
    %c0_i32 = arith.constant 0 : i32
    %c0_i32_0 = arith.constant 0 : i32
    return %arg0, %c0_i32 : i32, i32
  }
}

</mosaic_0001>

<bundles_post_ra>
// kernel: tpu_custom_call.1
= control target key start
LH: loop header
LB: loop body
LE: loop exit
PB: predicated region body
PF: predicated region fallthrough
CT: control target
= control target key end

     0   :  { %vm34_vm0 = vcmask 261120   ;;  %s508_s0 = inlined_call_operand.vmem [shape: f32[16,32], index: 0, kind: input, shape index: {}]   ;;  %s509_s1 = inlined_call_operand.vmem [shape: f32[32,128], index: 1, kind: input, shape index: {}]   ;;  %s510_s2 = inlined_call_operand.vmem [shape: f32[1,128], index: 2, kind: input, shape index: {}]   ;;  %s511_s3 = inlined_call_operand.vmem [shape: f32[128,32], index: 3, kind: input, shape index: {}]   ;;  %s512_s4 = inlined_call_operand.vmem [shape: f32[1,32], index: 4, kind: input, shape index: {}]   ;;  %s513_s5 = inlined_call_operand.hbm [shape: f32[16,32], index: 5, kind: output, shape index: {}]  }
   0x1   :  { %v23_v0 = vld [vmem:[%s509_s1] sm:$0xff]  ;;  %v24_v1 = vld [vmem:[%s509_s1 + $0x8] sm:$0xff]  ;;  %v25_v2 = vld [vmem:[%s509_s1 + $0x10] sm:$0xff] }
   0x2   :  { %v316_v3 = vpack.c.bf16 %v24_v1, %v23_v0  ;;  %v26_v4 = vld [vmem:[%s509_s1 + $0x18] sm:$0xff]  ;;  %v21_v5 = vld [vmem:[%s508_s0] sm:$0xff]  ;;  %v127_v8 = vld [vmem:[%s511_s3 + $0x8] sm:$0xff] }
   0x3   :  { %v320_v6 = vpack.c.bf16 %v26_v4, %v25_v2  ;;  %278 = vmatprep.mubr.msk.f32.mxu0 %vm34_vm0, %v21_v5  ;;  %v126_v7 = vld [vmem:[%s511_s3] sm:$0xff]  ;;  %v128_v9 = vld [vmem:[%s511_s3 + $0x10] sm:$0xff]  ;;  %v129_v11 = vld [vmem:[%s511_s3 + $0x18] sm:$0xff] }
   0x4   :  { %317 = vmatprep.subr.bf16.mxu0 %v316_v3  ;;  %v324_v10 = vpack.c.bf16 %v127_v8, %v126_v7  ;;  %v328_v12 = vpack.c.bf16 %v129_v11, %v128_v9  ;;  %v130_v13 = vld [vmem:[%s511_s3 + $0x20] sm:$0xff]  ;;  %v131_v14 = vld [vmem:[%s511_s3 + $0x28] sm:$0xff] }
   0x5   :  { %319 = vmatpush3.bf16.msra.mxu0 %v316_v3 }
   0x6   :  { %10 = vsyncpa [#allocation3], 0  ;;  %321 = vmatprep.subr.bf16.mxu0 %v320_v6  ;;  %325 = vmatprep.subr.bf16.mxu1 %v324_v10  ;;  %v332_v15 = vpack.c.bf16 %v131_v14, %v130_v13  ;;  %v22_v16 = vld [vmem:[%s508_s0 + $0x8] sm:$0xff]  ;;  %v132_v17 = vld [vmem:[%s511_s3 + $0x30] sm:$0xff]  ;;  %s387_s11 = smov [#allocation2]  }
   0x7   :  { %327 = vmatpush3.bf16.msra.mxu1 %v324_v10  ;;  %v133_v18 = vld [vmem:[%s511_s3 + $0x38] sm:$0xff]  ;;  %v134_v20 = vld [vmem:[%s511_s3 + $0x40] sm:$0xff]  ;;  %v135_v21 = vld [vmem:[%s511_s3 + $0x48] sm:$0xff]  ;;  %s231_s12 = sshll.u32 %s387_s11, 4  ;;  %s232_s12 = int_to_ptr.vmem [resolvable:$true] %s231_s12 }
   0x8   :  { %329 = vmatprep.subr.bf16.mxu1 %v328_v12  ;;  %v336_v19 = vpack.c.bf16 %v133_v18, %v132_v17  ;;  %v340_v22 = vpack.c.bf16 %v135_v21, %v134_v20  ;;  %v136_v23 = vld [vmem:[%s511_s3 + $0x50] sm:$0xff]  ;;  %v137_v24 = vld [vmem:[%s511_s3 + $0x58] sm:$0xff]  ;;  %v138_v26 = vld [vmem:[%s511_s3 + $0x60] sm:$0xff]  ;;  %s363_s13 = scalar_lea.vmem %s232_s12, 256  ;;  %p368_p1 = scmp.lt.s32.totalorder %s232_s12, %s232_s12 }
   0x9   :  { %323 = vmatpush3.bf16.msra.mxu0 %v320_v6  ;;  %v344_v25 = vpack.c.bf16 %v137_v24, %v136_v23  ;;  %v139_v27 = vld [vmem:[%s511_s3 + $0x68] sm:$0xff]  ;;  %v140_v29 = vld [vmem:[%s511_s3 + $0x70] sm:$0xff]  ;;  %v141_v30 = vld [vmem:[%s511_s3 + $0x78] sm:$0xff]  ;;  %p364_p0 = scmp.ne.s32.totalorder %s232_s12, %s363_s13  ;;  %p369_p2 = scmp.lt.s32.totalorder %s363_s13, %s363_s13 }
   0xa   :  { %v348_v28 = vpack.c.bf16 %v139_v27, %v138_v26  ;;  %v352_v31 = vpack.c.bf16 %v141_v30, %v140_v29  ;;  %v242_v32 = vld [vmem:[%s510_s2] ss:$0 sm:$0xff] }
   0xb   :  { %331 = vmatpush3.bf16.msra.mxu1 %v328_v12  ;;  %v245_v47 = vld [vmem:[%s512_s4] ss:$0 sm:$0xff]  ;;  %p370_p3 = por %p369_p2, %p368_p1 }
   0xc   :  { %279 = vmatmul.mubr.msk.f32.vlgmr.msra.gmra.mrb[0].mxu0 %vm34_vm0, %v22_v16  ;;  %333 = vmatprep.subr.bf16.mxu1 %v332_v15 }
   0xd   :  { %p371_p4 = pnand %p370_p3, %p364_p0 }
   0xf   :  { %335 = vmatpush3.bf16.msra.mxu1 %v332_v15 }
  0x10   :  { %337 = vmatprep.subr.bf16.mxu1 %v336_v19 }
  0x13   :  { %339 = vmatpush3.bf16.msra.mxu1 %v336_v19 }
  0x14   :  { %341 = vmatprep.subr.bf16.mxu1 %v340_v22 }
  0x17   :  { %343 = vmatpush3.bf16.msra.mxu1 %v340_v22 }
  0x18   :  { %345 = vmatprep.subr.bf16.mxu1 %v344_v25 }
  0x1b   :  { %347 = vmatpush3.bf16.msra.mxu1 %v344_v25 }
  0x1c   :  { %349 = vmatprep.subr.bf16.mxu1 %v348_v28 }
  0x1f   :  { %351 = vmatpush3.bf16.msra.mxu1 %v348_v28 }
  0x20   :  { %353 = vmatprep.subr.bf16.mxu1 %v352_v31 }
  0x23   :  { %355 = vmatpush3.bf16.msra.mxu1 %v352_v31 }
  0xdf   :  { %v280_v33 = vpop.f32.mrb[0].mxu0 }
  0xe0   :  { %v113_v34 = vadd.f32 %v280_v33, %v242_v32  ;;  %v107_v35 = vpop.f32.mrb[1].mxu0 }
  0xe1   :  { %v108_v36 = vadd.f32 %v242_v32, %v107_v35 }
  0xe2   :  { %v119_v37 = vmul.f32 0.70710677, %v113_v34  ;;  %v117_v44 = vmul.f32 0.5, %v113_v34 }
  0xe3   :  { %v118_v38 = vmul.f32 0.70710677, %v108_v36  ;;  %v116_v42 = vmul.f32 0.5, %v108_v36 }
  0xe4   :  { %359 = verf.f32 %v119_v37 }
  0xe5   :  { %361 = verf.f32 %v118_v38 }
  0xee   :  { %v360_v39 = vpop.eup %359 }
  0xef   :  { %v362_v40 = vpop.eup %361  ;;  %v123_v41 = vadd.f32 1.0, %v360_v39 }
  0xf0   :  { %v122_v43 = vadd.f32 1.0, %v362_v40 }
  0xf1   :  { %v125_v46 = vmul.f32 %v123_v41, %v117_v44 }
  0xf2   :  { %v124_v45 = vmul.f32 %v122_v43, %v116_v42 }
  0xf4   :  { %313 = vmatprep.mubr.f32.mxu1 %v124_v45 }
  0xf5   :  { %314 = vmatmul.mubr.f32.vlgmr.msra.gmra.mrb[0].mxu1 %v125_v46 }
 0x1c8   :  { %v315_v48 = vpop.f32.mrb[0].mxu1 }
 0x1c9   :  { %v221_v49 = vadd.f32 %v315_v48, %v245_v47  ;;  %v215_v50 = vpop.f32.mrb[1].mxu1 }
 0x1ca   :  { %v216_v51 = vadd.f32 %v245_v47, %v215_v50 }
 0x1cb   :  { %225 = vst.msk [vmem:[#allocation2 + $0x8] sm:$0xff] %vm34_vm0, %v221_v49 }
 0x1cc   :  { %224 = vst.msk [vmem:[#allocation2] sm:$0xff] %vm34_vm0, %v216_v51 }
 0x1cd   :  { %374 = shalt.err (!%p371_p4)
}
 0x1ce   :  { %s375_s15 = scalar_lea.hbm %s513_s5, 256 }
 0x1cf   :  { %p376_p5 = scmp.ne.s32.totalorder %s513_s5, %s375_s15  ;;  %p379_p6 = scmp.lt.u32.totalorder %s375_s15, %s513_s5 }
 0x1d1   :  { %p381_p7 = pnand %p379_p6, %p376_p5 }
 0x1d3   :  { %384 = shalt.err (!%p381_p7)
}
 0x1d4   :  { %s388_s20 = smov 128   ;;  %s389_s21 = smov 8  }
 0x1d5   :  { %237 = dma.vmem_to_hbm [thread:$0]  %s232_s12, 256, %s513_s5, [#allocation3], %s388_s20, %s388_s20, %s389_s21  }
 0x1d6   :  { %385 = dma.done.wait [#allocation3], 256  }
 0x1d7   :  { %386 = vsyncadd [#allocation3], 4294967040 }
 0x1d8   :  { %241 = vsyncpa [#allocation3], 1 }

</bundles_post_ra>
